<compile_context>
chip_gen: v6e
topology: v6e:2x2x1
jax: 0.10.0
libtpu: 0.0.40
codegen_flags: <defaults>
</compile_context>

<pallas_src>
import math
from functools import lru_cache, partial

import jax
import jax.numpy as jnp
from jax import lax
from jax.experimental import pallas as pl
from jax.experimental.pallas import tpu as pltpu


# --------------------------------------------------------------------------
# Per-generation tile / VMEM defaults
# --------------------------------------------------------------------------

@lru_cache(maxsize=None)
def _tpu_defaults():
    kind = ""
    try:
        kind = jax.devices()[0].device_kind.lower()
    except Exception:  # defensive: never let device introspection break us
        pass
    if "v6" in kind:
        # 128 MiB VMEM, 2x256x256 MXU -> keep TQ=256, bigger linear tiles.
        return dict(max_tq=256, max_tkv=512,
                    lin_tm=512, lin_tn=512, lin_tk=512, vmem=96 << 20)
    if "v5" in kind:
        # 128x128 MXU, small default VMEM scope -> TQ=128 loses nothing.
        return dict(max_tq=128, max_tkv=512,
                    lin_tm=256, lin_tn=512, lin_tk=512, vmem=96 << 20)
    # v7x (64 MiB physical VMEM) and unknown chips: conservative.
    return dict(max_tq=128, max_tkv=512,
                lin_tm=256, lin_tn=512, lin_tk=512, vmem=48 << 20)


def _round_up(x, m):
    return (x + m - 1) // m * m


def _largest_tile(dim, max_tile, quantum):
    """Largest multiple of `quantum` <= max_tile that divides dim (0 if none)."""
    t = (max_tile // quantum) * quantum
    while t >= quantum:
        if dim % t == 0:
            return t
        t -= quantum
    return 0


def _pick_tiling(dim, max_tile, quantum):
    """Return (tile, padded_dim): un-tiled if small, exact divisor, else pad."""
    if dim <= max_tile:
        return dim, dim
    t = _largest_tile(dim, max_tile, quantum)
    if t:
        return t, dim
    t = (max_tile // quantum) * quantum
    return t, _round_up(dim, t)


def _seq_tile(s, max_tile, quantum=8):
    if s <= max_tile:
        return s
    t = _largest_tile(s, max_tile, quantum)
    return t if t else s


# --------------------------------------------------------------------------
# linear: y = x @ W + b  (bf16 MXU operands, f32 accumulator)
# --------------------------------------------------------------------------

def _linear_kernel(x_ref, w_ref, b_ref, o_ref, acc_ref, *, compute_dtype):
    k = pl.program_id(2)

    @pl.when(k == 0)
    def _():
        acc_ref[...] = jnp.zeros_like(acc_ref)

    acc_ref[...] += jnp.dot(x_ref[...].astype(compute_dtype),
                            w_ref[...].astype(compute_dtype),
                            preferred_element_type=jnp.float32)

    @pl.when(k == pl.num_programs(2) - 1)
    def _():
        o_ref[...] = (acc_ref[...] + b_ref[...].astype(jnp.float32)
                      ).astype(o_ref.dtype)


def linear(x2d, w, b, *, out_dtype, max_tm=256, max_tn=512, max_tk=512,
           vmem_limit=48 << 20, compute_dtype=jnp.bfloat16):
    n, d_in = x2d.shape
    d_out = w.shape[1]

    tm, n_p = _pick_tiling(n, max_tm, 8)
    tn, d_out_p = _pick_tiling(d_out, max_tn, 128)
    tk, d_in_p = _pick_tiling(d_in, max_tk, 128)

    # Zero-pad ragged dims once (zeros contribute nothing; sliced off below).
    if n_p != n or d_in_p != d_in:
        x2d = jnp.pad(x2d, ((0, n_p - n), (0, d_in_p - d_in)))
    if d_in_p != d_in or d_out_p != d_out:
        w = jnp.pad(w, ((0, d_in_p - d_in), (0, d_out_p - d_out)))
    if d_out_p != d_out:
        b = jnp.pad(b, (0, d_out_p - d_out))

    grid = (n_p // tm, d_out_p // tn, d_in_p // tk)
    cost = pl.CostEstimate(
        flops=2 * n_p * d_out_p * d_in_p,
        transcendentals=0,
        bytes_accessed=(n_p * d_in_p * x2d.dtype.itemsize
                        + d_in_p * d_out_p * w.dtype.itemsize
                        + d_out_p * b.dtype.itemsize
                        + n_p * d_out_p * jnp.dtype(out_dtype).itemsize))

    y = pl.pallas_call(
        partial(_linear_kernel, compute_dtype=compute_dtype),
        out_shape=jax.ShapeDtypeStruct((n_p, d_out_p), out_dtype),
        grid_spec=pltpu.PrefetchScalarGridSpec(
            num_scalar_prefetch=0,
            grid=grid,
            in_specs=[
                pl.BlockSpec((tm, tk), lambda i, j, k: (i, k)),
                pl.BlockSpec((tk, tn), lambda i, j, k: (k, j)),
                pl.BlockSpec((1, tn), lambda i, j, k: (0, j)),
            ],
            out_specs=pl.BlockSpec((tm, tn), lambda i, j, k: (i, j)),
            scratch_shapes=[pltpu.VMEM((tm, tn), jnp.float32)],
        ),
        compiler_params=pltpu.CompilerParams(
            dimension_semantics=("parallel", "parallel", "arbitrary"),
            vmem_limit_bytes=vmem_limit),
        cost_estimate=cost,
    )(x2d, w, b.reshape(1, d_out_p))

    if n_p != n or d_out_p != d_out:
        y = y[:n, :d_out]
    return y


# --------------------------------------------------------------------------
# scaled dot-product attention
# --------------------------------------------------------------------------

def _attn_scores_kernel(q_ref, k_ref, v_ref, o_ref, s_ref, *, scale,
                        compute_dtype):
    # q_ref: (1, TQ, d_k); k_ref / v_ref: (1, S_kv, d_k).
    q = (q_ref[0] * scale).astype(compute_dtype)      # fold 1/sqrt(d_k) into Q
    k = k_ref[0].astype(compute_dtype)
    v = v_ref[0].astype(compute_dtype)
    # Contract the shared d_k axis directly (no K transpose); f32 accumulate.
    s = lax.dot_general(q, k, (((1,), (1,)), ((), ())),
                        preferred_element_type=jnp.float32)         # (TQ, S)
    s = jnp.exp(s - jnp.max(s, axis=-1, keepdims=True))             # reuse s
    p = s * pl.reciprocal(jnp.sum(s, axis=-1, keepdims=True), approx=False)
    # Mask: reference's masked_fill result is discarded -> no-op; skipped.
    # Dropout: identity (eval-mode semantics).
    s_ref[0, 0] = p.astype(s_ref.dtype)
    o_ref[0] = jnp.dot(p.astype(compute_dtype), v,
                       preferred_element_type=jnp.float32).astype(o_ref.dtype)


def _attn_flash_kernel(q_ref, k_ref, v_ref, o_ref, m_sc, l_sc, acc_sc, *,
                       scale, compute_dtype):
    # Online softmax over KV tiles (innermost "arbitrary" grid axis).
    ki = pl.program_id(3)

    @pl.when(ki == 0)
    def _():
        m_sc[...] = jnp.full_like(m_sc, -jnp.inf)
        l_sc[...] = jnp.zeros_like(l_sc)
        acc_sc[...] = jnp.zeros_like(acc_sc)

    q = (q_ref[0] * scale).astype(compute_dtype)
    s = lax.dot_general(q, k_ref[0].astype(compute_dtype),
                        (((1,), (1,)), ((), ())),
                        preferred_element_type=jnp.float32)       # (TQ, TKV)
    m_prev = m_sc[...]
    m_new = jnp.maximum(m_prev, jnp.max(s, axis=-1, keepdims=True))
    alpha = jnp.exp(m_prev - m_new)
    p = jnp.exp(s - m_new)
    l_sc[...] = alpha * l_sc[...] + jnp.sum(p, axis=-1, keepdims=True)
    acc_sc[...] = alpha * acc_sc[...] + jnp.dot(
        p.astype(compute_dtype), v_ref[0].astype(compute_dtype),
        preferred_element_type=jnp.float32)
    m_sc[...] = m_new

    @pl.when(ki == pl.num_programs(3) - 1)
    def _():
        o_ref[0] = (acc_sc[...] * pl.reciprocal(l_sc[...], approx=False)
                    ).astype(o_ref.dtype)


def attention(q_act, k_act, v_act, *, h, d_k, offs=(0, 0, 0),
              scores_dtype=jnp.float32, out_dtype=jnp.bfloat16,
              max_tq=128, max_tkv=512, vmem_limit=48 << 20,
              compute_dtype=jnp.bfloat16):
    """Per-head attention; head split folded into BlockSpec lane offsets.

    Head `hi` of activation `i` lives at lanes
    [(offs[i] + hi) * d_k : (offs[i] + hi + 1) * d_k].
    `scores_dtype=None` selects the KV-tiled online-softmax path (no scores
    materialized).  Returns (out (B, S_q, h*d_k), scores (B, h, S_q, S_kv)|None).
    """
    nb, s_q, _ = q_act.shape
    s_kv = k_act.shape[1]
    q_off, k_off, v_off = offs
    scale = 1.0 / math.sqrt(d_k)
    tq = _seq_tile(s_q, max_tq)

    act_b = q_act.dtype.itemsize
    flops = 4 * nb * h * s_q * s_kv * d_k
    trans = nb * h * s_q * s_kv
    bytes_acc = (nb * h * d_k * (s_q + 2 * s_kv) * act_b
                 + nb * h * s_q * d_k * jnp.dtype(out_dtype).itemsize)

    if scores_dtype is None:
        tkv = _seq_tile(s_kv, max_tkv)
        out = pl.pallas_call(
            partial(_attn_flash_kernel, scale=scale,
                    compute_dtype=compute_dtype),
            out_shape=jax.ShapeDtypeStruct((nb, s_q, h * d_k), out_dtype),
            grid_spec=pltpu.PrefetchScalarGridSpec(
                num_scalar_prefetch=0,
                grid=(nb, h, s_q // tq, s_kv // tkv),
                in_specs=[
                    pl.BlockSpec((1, tq, d_k),
                                 lambda bi, hi, qi, ki: (bi, qi, q_off + hi)),
                    pl.BlockSpec((1, tkv, d_k),
                                 lambda bi, hi, qi, ki: (bi, ki, k_off + hi)),
                    pl.BlockSpec((1, tkv, d_k),
                                 lambda bi, hi, qi, ki: (bi, ki, v_off + hi)),
                ],
                out_specs=pl.BlockSpec(
                    (1, tq, d_k), lambda bi, hi, qi, ki: (bi, qi, hi)),
                scratch_shapes=[pltpu.VMEM((tq, 1), jnp.float32),
                                pltpu.VMEM((tq, 1), jnp.float32),
                                pltpu.VMEM((tq, d_k), jnp.float32)],
            ),
            compiler_params=pltpu.CompilerParams(
                dimension_semantics=("parallel", "parallel", "parallel",
                                     "arbitrary"),
                vmem_limit_bytes=vmem_limit),
            cost_estimate=pl.CostEstimate(flops=flops, transcendentals=trans,
                                          bytes_accessed=bytes_acc),
        )(q_act, k_act, v_act)
        return out, None

    # Scores requested: the full (B, h, S_q, S_kv) tensor must be written out
    # anyway, so keep full-S_kv K/V blocks and materialize (TQ, S_kv) probs.
    # TODO(synk): pipeline_mode=pl.Buffered(1) on K/V (constant across qi)
    # would halve their VMEM residency on v7x's 64 MiB budget.
    bytes_acc += nb * h * s_q * s_kv * jnp.dtype(scores_dtype).itemsize
    out, scores = pl.pallas_call(
        partial(_attn_scores_kernel, scale=scale, compute_dtype=compute_dtype),
        out_shape=(jax.ShapeDtypeStruct((nb, s_q, h * d_k), out_dtype),
                   jax.ShapeDtypeStruct((nb, h, s_q, s_kv), scores_dtype)),
        grid_spec=pltpu.PrefetchScalarGridSpec(
            num_scalar_prefetch=0,
            grid=(nb, h, s_q // tq),
            in_specs=[
                pl.BlockSpec((1, tq, d_k),
                             lambda bi, hi, qi: (bi, qi, q_off + hi)),
                pl.BlockSpec((1, s_kv, d_k),
                             lambda bi, hi, qi: (bi, 0, k_off + hi)),
                pl.BlockSpec((1, s_kv, d_k),
                             lambda bi, hi, qi: (bi, 0, v_off + hi)),
            ],
            out_specs=(
                pl.BlockSpec((1, tq, d_k), lambda bi, hi, qi: (bi, qi, hi)),
                pl.BlockSpec((1, 1, tq, s_kv),
                             lambda bi, hi, qi: (bi, hi, qi, 0)),
            ),
        ),
        compiler_params=pltpu.CompilerParams(
            dimension_semantics=("parallel", "parallel", "parallel"),
            vmem_limit_bytes=vmem_limit),
        cost_estimate=pl.CostEstimate(flops=flops, transcendentals=trans,
                                      bytes_accessed=bytes_acc),
    )(q_act, k_act, v_act)
    return out, scores


# --------------------------------------------------------------------------
# module wrapper
# --------------------------------------------------------------------------

def init_params(key, d_model):
    """PyTorch-Linear-style init; weights stored as (d_in, d_out), f32."""
    bound = 1.0 / math.sqrt(d_model)
    names = ["q", "k", "v", "o"]
    keys = jax.random.split(key, 2 * len(names))
    params = {}
    for i, n in enumerate(names):
        params[f"w_{n}"] = jax.random.uniform(
            keys[2 * i], (d_model, d_model), jnp.float32, -bound, bound)
        params[f"b_{n}"] = jax.random.uniform(
            keys[2 * i + 1], (d_model,), jnp.float32, -bound, bound)
    return params


def prepare_params(params, *, compute_dtype=jnp.bfloat16):
    """One-time prep: weights -> bf16 MXU dtype, biases -> f32, and
    pre-concatenate the fused QKV weight/bias (NOT per forward pass)."""
    p = {k: (v.astype(compute_dtype) if k.startswith("w_")
             else v.astype(jnp.float32)) for k, v in params.items()}
    p["w_qkv"] = jnp.concatenate([p["w_q"], p["w_k"], p["w_v"]], axis=1)
    p["b_qkv"] = jnp.concatenate([p["b_q"], p["b_k"], p["b_v"]])
    return p


def multi_head_attention_block(q, k, v, mask, params, h, *,
                               return_scores=True, scores_dtype=jnp.float32):
    """Forward pass of MultiHeadAttentionBlock -> (output, attention_scores).
    attention_scores is None when return_scores=False (flash path)."""
    del mask  # masked_fill result is discarded in the reference -> no-op
    cfg = _tpu_defaults()
    b, s_q, d_model = q.shape
    s_kv = k.shape[1]
    assert d_model % h == 0, "d_model is not divisible by h"
    d_k = d_model // h
    act_dtype = jnp.bfloat16
    lin_kw = dict(max_tm=cfg["lin_tm"], max_tn=cfg["lin_tn"],
                  max_tk=cfg["lin_tk"], vmem_limit=cfg["vmem"])

    if q is k and k is v:
        # Self-attention: one fused QKV projection (single read of x).
        # NOTE: selected by object identity; pass the same array object to get
        # the fused path (otherwise falls back to three projections).
        qkv = linear(q.reshape(b * s_q, d_model),
                     params["w_qkv"], params["b_qkv"],
                     out_dtype=act_dtype, **lin_kw).reshape(b, s_q, 3 * d_model)
        acts, offs = (qkv, qkv, qkv), (0, h, 2 * h)
    else:
        def proj(x, wn, bn):
            nb_, s_, _ = x.shape
            return linear(x.reshape(nb_ * s_, d_model), params[wn], params[bn],
                          out_dtype=act_dtype, **lin_kw).reshape(nb_, s_, d_model)
        acts = (proj(q, "w_q", "b_q"), proj(k, "w_k", "b_k"),
                proj(v, "w_v", "b_v"))
        offs = (0, 0, 0)

    sdt = scores_dtype if return_scores else None
    attn_kw = dict(scores_dtype=sdt, out_dtype=act_dtype,
                   max_tq=cfg["max_tq"], max_tkv=cfg["max_tkv"],
                   vmem_limit=cfg["vmem"])

    if d_k % 128 == 0:
        # Fast path: head split folded into BlockSpec lane offsets.
        attn_out, scores = attention(*acts, h=h, d_k=d_k, offs=offs, **attn_kw)
    else:
        # Fallback for d_k not a lane-width multiple (e.g. 64): materialize a
        # (b*h, s, d_k) head-major layout (XLA transpose) and reuse the same
        # kernels with h=1 (block last dim == full array dim is allowed).
        def split_heads(act, off, s_len):
            x = act[:, :, off * d_k:(off + h) * d_k]
            x = x.reshape(b, s_len, h, d_k).transpose(0, 2, 1, 3)
            return x.reshape(b * h, s_len, d_k)
        qh = split_heads(acts[0], offs[0], s_q)
        kh = split_heads(acts[1], offs[1], s_kv)
        vh = split_heads(acts[2], offs[2], s_kv)
        out_h, scores_h = attention(qh, kh, vh, h=1, d_k=d_k, offs=(0, 0, 0),
                                    **attn_kw)
        attn_out = out_h.reshape(b, h, s_q, d_k).transpose(0, 2, 1, 3
                                                           ).reshape(b, s_q, d_model)
        scores = (None if scores_h is None
                  else scores_h.reshape(b, h, s_q, s_kv))

    out = linear(attn_out.reshape(b * s_q, d_model),
                 params["w_o"], params["b_o"],
                 out_dtype=jnp.float32, **lin_kw).reshape(b, s_q, d_model)
    return out, scores


# Pure-JAX f32 reference for verification.
def reference_forward(q, k, v, params, h):
    b, _, d_model = q.shape
    d_k = d_model // h
    query = q @ params["w_q"] + params["b_q"]
    key = k @ params["w_k"] + params["b_k"]
    value = v @ params["w_v"] + params["b_v"]
    qh = query.reshape(b, -1, h, d_k).transpose(0, 2, 1, 3)
    kh = key.reshape(b, -1, h, d_k).transpose(0, 2, 1, 3)
    vh = value.reshape(b, -1, h, d_k).transpose(0, 2, 1, 3)
    scores = jnp.einsum("bhqd,bhkd->bhqk", qh, kh) / math.sqrt(d_k)
    p = jax.nn.softmax(scores, axis=-1)
    x = jnp.einsum("bhqk,bhkd->bhqd", p, vh)
    x = x.transpose(0, 2, 1, 3).reshape(b, -1, d_model)
    return x @ params["w_o"] + params["b_o"], p


if __name__ == "__main__":
    B, S, H = 2, 16, 2
    D_K = 128
    D_MODEL = H * D_K          # 256

    key = jax.random.PRNGKey(0)
    kq, kk, kv, kp = jax.random.split(key, 4)
    q = jax.random.normal(kq, (B, S, D_MODEL), jnp.float32)
    k = jax.random.normal(kk, (B, S, D_MODEL), jnp.float32)
    v = jax.random.normal(kv, (B, S, D_MODEL), jnp.float32)
    mask = jnp.ones((B, 1, S, S), jnp.float32)   # no-op (see semantics note)

    params_f32 = init_params(kp, D_MODEL)
    params = prepare_params(params_f32)

    TOL = dict(atol=6e-2, rtol=6e-2)     # bf16 MXU operands vs f32 reference
    STOL = dict(atol=3e-2, rtol=0.0)

    # 1) Self-attention, scores materialized (fused QKV projection).
    out, scores = multi_head_attention_block(q, q, q, mask, params, H)
    out = jax.block_until_ready(out)
    scores = jax.block_until_ready(scores)
    ref_out, ref_scores = reference_forward(q, q, q, params_f32, H)
    assert out.shape == (B, S, D_MODEL) and scores.shape == (B, H, S, S)
    assert jnp.allclose(out, ref_out, **TOL)
    assert jnp.allclose(scores, ref_scores, **STOL)

    # 2) Self-attention, no scores -> KV-tiled online-softmax (flash) path.
    out_f, scores_f = multi_head_attention_block(q, q, q, mask, params, H,
                                                 return_scores=False)
    out_f = jax.block_until_ready(out_f)
    assert scores_f is None
    assert jnp.allclose(out_f, ref_out, **TOL)

    # 3) Cross-attention (distinct q/k/v -> three projection calls).
    out_x, scores_x = multi_head_attention_block(q, k, v, mask, params, H)
    out_x = jax.block_until_ready(out_x)
    scores_x = jax.block_until_ready(scores_x)
    ref_out_x, ref_scores_x = reference_forward(q, k, v, params_f32, H)
    assert jnp.allclose(out_x, ref_out_x, **TOL)
    assert jnp.allclose(scores_x, ref_scores_x, **STOL)

    # 4) d_k = 64 (not a lane-width multiple) -> head-major fallback layout.
    H2 = 4
    out_64, scores_64 = multi_head_attention_block(q, q, q, mask, params, H2)
    out_64 = jax.block_until_ready(out_64)
    scores_64 = jax.block_until_ready(scores_64)
    ref_out_64, ref_scores_64 = reference_forward(q, q, q, params_f32, H2)
    assert scores_64.shape == (B, H2, S, S)
    assert jnp.allclose(out_64, ref_out_64, **TOL)
    assert jnp.allclose(scores_64, ref_scores_64, **STOL)

    print("KERNEL_OK")
</pallas_src>

<mosaic_0001>
module attributes {stable_mosaic.version = 11 : i64} {
  func.func @_linear_kernel(%arg0: i32, %arg1: i32, %arg2: i32, %arg3: memref<32x256xf32, #tpu.memory_space<vmem>>, %arg4: memref<256x384xbf16, #tpu.memory_space<vmem>>, %arg5: memref<1x384xf32, #tpu.memory_space<vmem>>, %arg6: memref<32x384xbf16, #tpu.memory_space<vmem>>, %arg7: memref<32x384xf32, #tpu.memory_space<vmem>>) attributes {dimension_semantics = [#tpu.dimension_semantics<parallel>, #tpu.dimension_semantics<parallel>, #tpu.dimension_semantics<arbitrary>], iteration_bounds = array<i64: 1, 2, 1>, scalar_prefetch = 0 : i64, scratch_operands = 1 : i64, tpu.core_type = #tpu.core_type<tc>, window_params = [{transform_indices = @transform_0, window_bounds = array<i64: 32, 256>}, {transform_indices = @transform_1, window_bounds = array<i64: 256, 384>}, {transform_indices = @transform_2, window_bounds = array<i64: 1, 384>}, {transform_indices = @transform_3, window_bounds = array<i64: 32, 384>}]} {
    %c0_i32 = arith.constant 0 : i32
    %0 = arith.cmpi eq, %arg2, %c0_i32 : i32
    %1 = arith.extui %0 : i1 to i32
    %c0_i32_0 = arith.constant 0 : i32
    %2 = arith.cmpi ne, %1, %c0_i32_0 : i32
    scf.if %2 {
      %cst_10 = arith.constant 0.000000e+00 : f32
      %13 = vector.broadcast %cst_10 : f32 to vector<32x384xf32>
      %c0_11 = arith.constant 0 : index
      %c0_12 = arith.constant 0 : index
      %14 = vector.load %arg7[%c0_11, %c0_12] : memref<32x384xf32, #tpu.memory_space<vmem>>, vector<32x384xf32>
      tpu.vector_store %arg7[%c0_11, %c0_12], %13 {strides = array<i32>} : memref<32x384xf32, #tpu.memory_space<vmem>>, vector<32x384xf32>,
    } else {
    }
    %c0 = arith.constant 0 : index
    %c0_1 = arith.constant 0 : index
    %3 = vector.load %arg7[%c0, %c0_1] : memref<32x384xf32, #tpu.memory_space<vmem>>, vector<32x384xf32>
    %c0_2 = arith.constant 0 : index
    %c0_3 = arith.constant 0 : index
    %4 = vector.load %arg3[%c0_2, %c0_3] : memref<32x256xf32, #tpu.memory_space<vmem>>, vector<32x256xf32>
    %5 = arith.truncf %4 : vector<32x256xf32> to vector<32x256xbf16>
    %c0_4 = arith.constant 0 : index
    %c0_5 = arith.constant 0 : index
    %6 = vector.load %arg4[%c0_4, %c0_5] : memref<256x384xbf16, #tpu.memory_space<vmem>>, vector<256x384xbf16>
    %cst = arith.constant dense<0.000000e+00> : vector<32x384xf32>
    %7 = tpu.matmul %5, %6, %cst {dimension_numbers = #tpu.dot_dimension_numbers<[1], [0], [0], [1], [0, 0, 1, 1], [], []>} : vector<32x256xbf16>, vector<256x384xbf16>, vector<32x384xf32> -> vector<32x384xf32>
    %8 = arith.addf %3, %7 : vector<32x384xf32>
    %c0_6 = arith.constant 0 : index
    %c0_7 = arith.constant 0 : index
    %9 = vector.load %arg7[%c0_6, %c0_7] : memref<32x384xf32, #tpu.memory_space<vmem>>, vector<32x384xf32>
    tpu.vector_store %arg7[%c0_6, %c0_7], %8 {strides = array<i32>} : memref<32x384xf32, #tpu.memory_space<vmem>>, vector<32x384xf32>,
    %c0_i32_8 = arith.constant 0 : i32
    %10 = arith.cmpi eq, %arg2, %c0_i32_8 : i32
    %11 = arith.extui %10 : i1 to i32
    %c0_i32_9 = arith.constant 0 : i32
    %12 = arith.cmpi ne, %11, %c0_i32_9 : i32
    scf.if %12 {
      %c0_10 = arith.constant 0 : index
      %c0_11 = arith.constant 0 : index
      %13 = vector.load %arg7[%c0_10, %c0_11] : memref<32x384xf32, #tpu.memory_space<vmem>>, vector<32x384xf32>
      %c0_12 = arith.constant 0 : index
      %c0_13 = arith.constant 0 : index
      %14 = vector.load %arg5[%c0_12, %c0_13] : memref<1x384xf32, #tpu.memory_space<vmem>>, vector<1x384xf32>
      %15 = vector.broadcast %14 : vector<1x384xf32> to vector<32x384xf32>
      %16 = arith.addf %13, %15 : vector<32x384xf32>
      %17 = arith.truncf %16 : vector<32x384xf32> to vector<32x384xbf16>
      %c0_14 = arith.constant 0 : index
      %c0_15 = arith.constant 0 : index
      %18 = vector.load %arg6[%c0_14, %c0_15] : memref<32x384xbf16, #tpu.memory_space<vmem>>, vector<32x384xbf16>
      tpu.vector_store %arg6[%c0_14, %c0_15], %17 {strides = array<i32>} : memref<32x384xbf16, #tpu.memory_space<vmem>>, vector<32x384xbf16>,
    } else {
    }
    return
  }
  func.func @transform_0(%arg0: i32, %arg1: i32, %arg2: i32) -> (i32, i32) {
    %c0_i32 = arith.constant 0 : i32
    return %arg0, %arg2 : i32, i32
  }
  func.func @transform_1(%arg0: i32, %arg1: i32, %arg2: i32) -> (i32, i32) {
    %c0_i32 = arith.constant 0 : i32
    return %arg2, %arg1 : i32, i32
  }
  func.func @transform_2(%arg0: i32, %arg1: i32, %arg2: i32) -> (i32, i32) {
    %c0_i32 = arith.constant 0 : i32
    %c0_i32_0 = arith.constant 0 : i32
    return %c0_i32, %arg1 : i32, i32
  }
  func.func @transform_3(%arg0: i32, %arg1: i32, %arg2: i32) -> (i32, i32) {
    %c0_i32 = arith.constant 0 : i32
    return %arg0, %arg1 : i32, i32
  }
}

</mosaic_0001>

<bundles_post_ra>
// kernel: tpu_custom_call.1
= control target key start
LH: loop header
LB: loop body
LE: loop exit
PB: predicated region body
PF: predicated region fallthrough
CT: control target
= control target key end

     0   :  { %8 = vsyncpa [#allocation4], 0  ;;  %s1732_s0 = inlined_call_operand.hbm [shape: f32[32,256], index: 0, kind: input, shape index: {}]   ;;  %s1733_s1 = inlined_call_operand.hbm [shape: bf16[256,768], index: 1, kind: input, shape index: {}]   ;;  %s1734_s2 = inlined_call_operand.hbm [shape: f32[1,768], index: 2, kind: input, shape index: {}]   ;;  %s1735_s3 = inlined_call_operand.hbm [shape: bf16[32,768], index: 3, kind: output, shape index: {}]  }
   0x1   :  { %9 = vsyncpa [#allocation7], 0 }
   0x2   :  { %11 = vsyncpa [#allocation7 + $0x1], 0 }
   0x3   :  { %12 = vsyncpa [#allocation5], 0 }
   0x4   :  { %14 = vsyncpa [#allocation5 + $0x1], 0  ;;  %s1470_s12 = smov 0   ;;  %s1472_s13 = smov 0  }
   0x5   :  { %s1474_s14 = smov 0   ;;  %s1476_s15 = smov 0  }
   0x6   :  { %s1478_s16 = smov 0   ;;  %s1480_s17 = smov 0  }
   0x7 LB: > { %s35_s18 = sadd.s32 1, %s1432_s16  ;;  %s76_s19 = sadd.s32 1, %s1424_s14  ;;  %s1436_s17 = sphi %s1480_s17, %s20_s17   ;;  %s1432_s16 = sphi %s1478_s16, %s1755_s16   ;;  %s1428_s15 = sphi %s1476_s15, %s1754_s15   ;;  %s1424_s14 = sphi %s1474_s14, %s1753_s14   ;;  %s1420_s13 = sphi %s1472_s13, %s1752_s13   ;;  %s1416_s12 = sphi %s1470_s12, %s1751_s12  }
   0x8   : > { %p37_p0 = scmp.ge.s32.totalorder %s35_s18, 2  ;;  %p83_p1 = scmp.ne.s32.totalorder %s1424_s14, %s1420_s13 }
   0x9   : > { %p84_p2 = scmp.eq.s32.totalorder %s1436_s17, 0  ;;  %p1146_p5 = scmp.lt.s32.totalorder %s1436_s17, 2 }
   0xa   : > { %s1757_s18 = smov (%p37_p0, %s35_s18), 0  ;;  %s186_s21 = sand.u32 1, %s1436_s17  }
   0xb   : > { %p85_p4 = por %p84_p2, %p83_p1  ;;  %s72_s20 = ssub.s32 %s1432_s16, %s1757_s18 }
   0xc   : > { %p74_p6 = scmp.eq.s32.totalorder %s72_s20, 0  ;;  %s188_s22 = sand.u32 1, %s1424_s14  }
   0xd   : > { %s1076_s23 = smul.u32 192, %s1432_s16  ;;  %p1525_p7 = pnand %p1146_p5, %p85_p4 }
   0xe   : > { %s1518_s24 = scalar_select %p74_p6, %s1424_s14, %s76_s19  }
   0xf   : > { %s1115_s25 = smul.u32 384, %s188_s22  ;;  %s199_s28 = scalar_lea.hbm %s1733_s1, %s1076_s23 }
  0x10   : > { %s1529_s5 = scalar_lea.sflag [#allocation7], %s186_s21  ;;  %p1737_p8 = pneg %p1525_p7 }
  0x11   : > { %s190_s30 = scalar_lea.vmem [#allocation6], %s1115_s25  ;;  %s1438_s7 = smov [#allocation6]  }
  0x12   : > { %s200_s4 = sshll.u32 %s190_s30, 4  ;;  %s1288_s8 = sshll.u32 %s1438_s7, 4  ;;  %s201_s4 = int_to_ptr.vmem [resolvable:$true] %s200_s4  ;;  %s1289_s8 = int_to_ptr.vmem [resolvable:$false] %s1288_s8 }
  0x13   : > { %s1283_s6 = scalar_lea.vmem %s201_s4, 6144  ;;  %s1290_s9 = scalar_lea.vmem %s1289_s8, 12288 }
  0x14   : > { %p1284_p9 = scmp.ne.s32.totalorder %s201_s4, %s1283_s6  ;;  %p1291_p12 = scmp.lt.s32.totalorder %s201_s4, %s1289_s8 }
  0x15   : > { %p1292_p13 = scmp.lt.s32.totalorder %s1290_s9, %s1283_s6 }
  0x16   : > { %p1286_p10 = pnand %p1284_p9, %p1737_p8 }
  0x17   : > { %p1293_p0 = por %p1292_p13, %p1291_p12 }
  0x18   : > { %p1287_p11 = pneg %p1286_p10 }
  0x1a   : > { %p1294_p2 = pnand %p1293_p0, %p1287_p11 }
  0x1c   : > { %1297 = shalt.err (!%p1294_p2)
}
  0x1d   : > { %s1439_s10 = smov 384   ;;  %s1440_s11 = smov 192  }
  0x1e   : > { %s1441_s19 = smov 12   ;;  %s1540_s20 = sadd.s32 4294967295, %s1436_s17  }
  0x1f   : > { %1137 = dma.hbm_to_vmem [thread:$0]  (!%p1525_p7), %s199_s28, 6144, %s201_s4, %s1529_s5, %s1439_s10, %s1440_s11, %s1441_s19  }
  0x20   : > { %s1009_s21 = sadd.s32 4294967294, %s1436_s17   ;;  %p89_p4 = scmp.ne.s32.totalorder %s1420_s13, %s1416_s12 }
  0x21   : > { %p1736_p5 = scmp.eq.s32.totalorder %s1540_s20, 0  ;;  %p141_p6 = scmp.eq.s32.totalorder %s1540_s20, 1 }
  0x22   : > { %p147_p9 = scmp.eq.s32.totalorder %s1009_s21, 1  ;;  %p1010_p11 = scmp.ge.s32.totalorder %s1436_s17, 1 }
  0x23   : > { %p1549_p10 = por %p1736_p5, %p89_p4  ;;  %p1557_p12 = por %p141_p6, %p83_p1 }
  0x24   : > { %p1561_p13 = por %p147_p9, %p89_p4  ;;  %p154_p0 = scmp.lt.s32.totalorder %s1436_s17, 3 }
  0x25   : > { %s1741_s25 = scalar_select %p1557_p12, 1, 0 }
  0x26   : > { %s1742_s26 = scalar_select %p1561_p13, 1, 0 }
  0x27   : > { %p1566_p2 = pnand %p1010_p11, %p154_p0  ;;  %s1442_s28 = smov [#allocation3]  }
  0x28   : > { %s172_s30 = sshll.u32 %s1442_s28, 4  ;;  %s1116_s4 = smul.u32 3, %s188_s22  ;;  %s173_s30 = int_to_ptr.vmem [resolvable:$true] %s172_s30 }
  0x29   : > { %p1130_p3 = pneg %p1566_p2  ;;  %s1077_s6 = smul.u32 48, %s1432_s16 }
  0x2a   : > { %s214_s11 = scalar_lea.vmem [#allocation8], %s1116_s4  ;;  %s1309_s21 = scalar_lea.vmem %s173_s30, 1024 }
  0x2b   : > { %p1577_p1 = pnand %p1130_p3, %p1736_p5  ;;  %s1584_s10 = scalar_lea.hbm %s1734_s2, %s1077_s6 }
  0x2c   : > { %s222_s19 = sshll.u32 %s214_s11, 4  ;;  %p1310_p6 = scmp.ne.s32.totalorder %s173_s30, %s1309_s21  ;;  %s223_s19 = int_to_ptr.vmem [resolvable:$true] %s222_s19 }
  0x2d   : > { %p1300_p4 = pneg %p1577_p1  ;;  %p1317_p0 = scmp.lt.s32.totalorder %s173_s30, %s173_s30 }
  0x2e   : > { %p1318_p3 = scmp.lt.s32.totalorder %s1309_s21, %s1309_s21 }
  0x2f   : > { %p1312_p9 = pnand %p1310_p6, %p1300_p4 }
  0x30   : > { %p1319_p5 = por %p1318_p3, %p1317_p0 }
  0x31   : > { %p1313_p11 = pneg %p1312_p9 }
  0x33   : > { %p1320_p8 = pnand %p1319_p5, %p1313_p11 }
  0x35   : > { %1323 = shalt.err (!%p1320_p8)
}
  0x36   : > { %s1443_s22 = smov 256   ;;  %s1444_s28 = smov 16  }
  0x37   : > { %1133 = dma.hbm_to_vmem [thread:$0]  (!%p1577_p1), %s1732_s0, 1024, %s173_s30, [#allocation4], %s1443_s22, %s1443_s22, %s1444_s28  }
  0x38   : > { %s1337_s8 = scalar_lea.vmem %s223_s19, 48  ;;  %p1745_p12 = pneg %p1525_p7 }
  0x39   : > { %p1338_p13 = scmp.ne.s32.totalorder %s223_s19, %s1337_s8  ;;  %s1445_s9 = smov [#allocation8]  }
  0x3a   : > { %s1342_s11 = sshll.u32 %s1445_s9, 4  ;;  %s1343_s11 = int_to_ptr.vmem [resolvable:$false] %s1342_s11 }
  0x3b   : > { %p1340_p4 = pnand %p1338_p13, %p1745_p12  ;;  %s1344_s21 = scalar_lea.vmem %s1343_s11, 96 }
  0x3c   : > { %p1345_p8 = scmp.lt.s32.totalorder %s223_s19, %s1343_s11  ;;  %p1346_p5 = scmp.lt.s32.totalorder %s1344_s21, %s1337_s8 }
  0x3d   : > { %p1341_p6 = pneg %p1340_p4 }
  0x3e   : > { %p1347_p9 = por %p1346_p5, %p1345_p8 }
  0x40   : > { %p1348_p11 = pnand %p1347_p9, %p1341_p6 }
  0x42   : > { %1351 = shalt.err (!%p1348_p11)
}
  0x43   : > { %1140 = dma.hbm_to_vmem [thread:$0]  (!%p1525_p7), %s1584_s10, 48, %s223_s19, %s1529_s5  }
  0x44   : > { %231 = sbr.rel (%p1566_p2) target bundleno = 370 (0x172), region = 32  ;;  %p1746_p12 = scmp.eq.s32.totalorder (!%p1566_p2), %s1540_s20, 0 }
  0x49   : > { %1403 = dma.done.wait (%p1746_p12), [#allocation4], 1024   ;;  %p1747_p13 = pmov %p1746_p12 }
  0x4a   : > { %s237_s30 = sand.u32 1, %s1540_s20   ;;  %s1608_s7 = sand.u32 1, %s1420_s13  }
  0x4b   : > { %1405 = vsyncadd (%p1747_p13), [#allocation4], 4294966272  ;;  %s1117_s29 = smul.u32 384, %s1608_s7  ;;  %s238_s22 = scalar_lea.sflag [#allocation7], %s237_s30 }
  0x4d   : > { %s1611_s28 = scalar_lea.vmem [#allocation6], %s1117_s29 }
  0x4e   : > { %1407 = dma.done.wait (%p1549_p10), %s238_s22, 6192  }
  0x4f   : > { %1409 = vsyncadd (%p1549_p10), %s238_s22, 4294961104  ;;  %v1206_v0 = vld [vmem:[%s1611_s28 + $0xac] ss:$12 sps:$4 sm:$0xff]   ;;  %v1208_v1 = vld [vmem:[%s1611_s28 + $0xa8] ss:$12 sps:$4 sm:$0xff]   ;;  %v789_v60 = vlaneseq  ;;  %s1118_s5 = smul.u32 3, %s1608_s7 }
  0x50   : > { %646 = vmatprep.subr.bf16.mxu0 %v1206_v0  ;;  %v1209_v2 = vld [vmem:[%s1611_s28 + $0x94] ss:$12 sps:$4 sm:$0xff]   ;;  %v1211_v3 = vld [vmem:[%s1611_s28 + $0x90] ss:$12 sps:$4 sm:$0xff]   ;;  %v1214_v5 = vld [vmem:[%s1611_s28 + $0x78] ss:$12 sps:$4 sm:$0xff]  }
  0x51   : > { %647 = vmatpush1.bf16.msra.mxu0 %v1208_v1  ;;  %v1212_v4 = vld [vmem:[%s1611_s28 + $0x7c] ss:$12 sps:$4 sm:$0xff]   ;;  %v1215_v6 = vld [vmem:[%s1611_s28 + $0x64] ss:$12 sps:$4 sm:$0xff]   ;;  %v1217_v8 = vld [vmem:[%s1611_s28 + $0x60] ss:$12 sps:$4 sm:$0xff]  }
  0x52   : > { %648 = vmatprep.subr.bf16.mxu0 %v1209_v2  ;;  %v1226_v7 = vld [vmem:[%s1611_s28 + $0x170] ss:$12 sps:$4 sm:$0xff]   ;;  %v1218_v10 = vld [vmem:[%s1611_s28 + $0x4c] ss:$12 sps:$4 sm:$0xff]   ;;  %v1220_v13 = vld [vmem:[%s1611_s28 + $0x48] ss:$12 sps:$4 sm:$0xff]  }
  0x53   : > { %1087 = vmatprep.subr.bf16.mxu1 %v1226_v7  ;;  %v1228_v9 = vld [vmem:[%s1611_s28 + $0xb0] ss:$12 sps:$4 sm:$0xff]   ;;  %v1231_v11 = vld [vmem:[%s1611_s28 + $0x158] ss:$12 sps:$4 sm:$0xff]   ;;  %v1221_v14 = vld [vmem:[%s1611_s28 + $0x34] ss:$12 sps:$4 sm:$0xff]  }
  0x54   : > { %1088 = vmatpush3.bf16.msra.mxu1 %v1228_v9  ;;  %v1233_v12 = vld [vmem:[%s1611_s28 + $0x98] ss:$12 sps:$4 sm:$0xff]   ;;  %v1236_v15 = vld [vmem:[%s1611_s28 + $0x140] ss:$12 sps:$4 sm:$0xff]   ;;  %v1223_v17 = vld [vmem:[%s1611_s28 + $0x30] ss:$12 sps:$4 sm:$0xff]  }
  0x55   : > { %649 = vmatpush1.bf16.msra.mxu0 %v1211_v3  ;;  %1089 = vmatprep.subr.bf16.mxu1 %v1231_v11  ;;  %v1238_v16 = vld [vmem:[%s1611_s28 + $0x80] ss:$12 sps:$4 sm:$0xff]   ;;  %v1241_v18 = vld [vmem:[%s1611_s28 + $0x128] ss:$12 sps:$4 sm:$0xff]   ;;  %v1227_v21 = vld [vmem:[%s1611_s28 + $0x18] ss:$12 sps:$4 sm:$0xff]  }
  0x56   : > { %650 = vmatprep.subr.bf16.mxu0 %v1212_v4  ;;  %v1224_v19 = vld [vmem:[%s1611_s28 + $0x1c] ss:$12 sps:$4 sm:$0xff]   ;;  %v1229_v23 = vld [vmem:[%s1611_s28 + $0x4] ss:$12 sps:$4 sm:$0xff]   ;;  %v1232_v26 = vld [vmem:[%s1611_s28] ss:$12 sps:$4 sm:$0xff]  }
  0x57   : > { %v1243_v20 = vld [vmem:[%s1611_s28 + $0x68] ss:$12 sps:$4 sm:$0xff]   ;;  %v1246_v22 = vld [vmem:[%s1611_s28 + $0x110] ss:$12 sps:$4 sm:$0xff]   ;;  %v1251_v25 = vld [vmem:[%s1611_s28 + $0xf8] ss:$12 sps:$4 sm:$0xff]  }
  0x58   : > { %1090 = vmatpush3.bf16.msra.mxu1 %v1233_v12  ;;  %v1248_v24 = vld [vmem:[%s1611_s28 + $0x50] ss:$12 sps:$4 sm:$0xff]   ;;  %v1234_v27 = vld [vmem:[%s1611_s28 + $0x16c] ss:$12 sps:$4 sm:$0xff]   ;;  %v1237_v30 = vld [vmem:[%s1611_s28 + $0x168] ss:$12 sps:$4 sm:$0xff]  }
  0x59   : > { %651 = vmatpush1.bf16.msra.mxu0 %v1214_v5  ;;  %1091 = vmatprep.subr.bf16.mxu1 %v1236_v15  ;;  %v1253_v28 = vld [vmem:[%s1611_s28 + $0x38] ss:$12 sps:$4 sm:$0xff]   ;;  %v1256_v29 = vld [vmem:[%s1611_s28 + $0xe0] ss:$12 sps:$4 sm:$0xff]   ;;  %v1242_v32 = vld [vmem:[%s1611_s28 + $0x150] ss:$12 sps:$4 sm:$0xff]  }
  0x5a   : > { %652 = vmatprep.subr.bf16.mxu0 %v1215_v6  ;;  %v1239_v31 = vld [vmem:[%s1611_s28 + $0x154] ss:$12 sps:$4 sm:$0xff]   ;;  %v315_v35 = vld [vmem:[#allocation3 + $0x8] sm:$0xff]  ;;  %v317_v36 = vld [vmem:[#allocation3 + $0x18] sm:$0xff]  ;;  %v790_v61 = vshrl.u32 %v789_v60, 7  ;;  %s250_s20 = scalar_lea.vmem [#allocation8], %s1118_s5 }
  0x5b   : > { %v1258_v33 = vld [vmem:[%s1611_s28 + $0x20] ss:$12 sps:$4 sm:$0xff]   ;;  %v1261_v34 = vld [vmem:[%s1611_s28 + $0xc8] ss:$12 sps:$4 sm:$0xff]   ;;  %v323_v39 = vpack.c.bf16 %v317_v36, %v315_v35  ;;  %v1247_v43 = vld [vmem:[%s1611_s28 + $0x138] ss:$12 sps:$4 sm:$0xff]  }
  0x5c   : > { %1092 = vmatpush3.bf16.msra.mxu1 %v1238_v16  ;;  %v1244_v37 = vld [vmem:[%s1611_s28 + $0x13c] ss:$12 sps:$4 sm:$0xff]   ;;  %v314_v40 = vld [vmem:[#allocation3] sm:$0xff]  ;;  %v316_v41 = vld [vmem:[#allocation3 + $0x10] sm:$0xff]  ;;  %v799_v62 = vsub.s32 2, %v790_v61  ;;  %s1119_s23 = smul.u32 48, %s1608_s7 }
  0x5d   : > { %653 = vmatpush1.bf16.msra.mxu0 %v1217_v8  ;;  %1093 = vmatprep.subr.bf16.mxu1 %v1241_v18  ;;  %v1263_v38 = vld [vmem:[%s1611_s28 + $0x8] ss:$12 sps:$4 sm:$0xff]   ;;  %v321_v44 = vld [vmem:[#allocation3 + $0x38] sm:$0xff]  ;;  %v1249_v45 = vld [vmem:[%s1611_s28 + $0x124] ss:$12 sps:$4 sm:$0xff]   ;;  %v322_v46 = vpack.c.bf16 %v316_v41, %v314_v40  ;;  %s1086_s19 = smul.u32 192, %s1428_s15 }
  0x5e   : > { %654 = vmatprep.subr.bf16.mxu0 %v1218_v10  ;;  %731 = vmatprep.mubr.bf16.mxu1 %v323_v39  ;;  %v319_v42 = vld [vmem:[#allocation3 + $0x28] sm:$0xff]  ;;  %v318_v50 = vld [vmem:[#allocation3 + $0x20] sm:$0xff]  ;;  %v320_v51 = vld [vmem:[#allocation3 + $0x30] sm:$0xff]  ;;  %s1667_s27 = scalar_lea.vmem [#allocation9], %s1119_s23  ;;  %s865_s9 = scalar_lea.sflag [#allocation5], %s1608_s7 }
  0x5f   : > { %678 = vmatprep.mubr.bf16.mxu0 %v323_v39  ;;  %v325_v47 = vpack.c.bf16 %v321_v44, %v319_v42  ;;  %v1252_v48 = vld [vmem:[%s1611_s28 + $0x120] ss:$12 sps:$4 sm:$0xff]   ;;  %v1257_v52 = vld [vmem:[%s1611_s28 + $0x108] ss:$12 sps:$4 sm:$0xff]   ;;  %v324_v54 = vpack.c.bf16 %v320_v51, %v318_v50  ;;  %v1262_v55 = vld [vmem:[%s1611_s28 + $0xf0] ss:$12 sps:$4 sm:$0xff]   ;;  %s1683_s8 = scalar_lea.hbm %s1735_s3, %s1086_s19 }
  0x60   : > { %1094 = vmatpush3.bf16.msra.mxu1 %v1243_v20  ;;  %v1254_v49 = vld [vmem:[%s1611_s28 + $0x10c] ss:$12 sps:$4 sm:$0xff]   ;;  %v1259_v53 = vld [vmem:[%s1611_s28 + $0xf4] ss:$12 sps:$4 sm:$0xff]   ;;  %v1264_v56 = vld [vmem:[%s1611_s28 + $0xdc] ss:$12 sps:$4 sm:$0xff]  }
  0x61   : > { %655 = vmatpush1.bf16.msra.mxu0 %v1220_v13  ;;  %1095 = vmatprep.subr.bf16.mxu1 %v1246_v22  ;;  %v1266_v57 = vld [vmem:[%s1611_s28 + $0xd8] ss:$12 sps:$4 sm:$0xff]   ;;  %v1269_v59 = vld [vmem:[%s1611_s28 + $0xc0] ss:$12 sps:$4 sm:$0xff]   ;;  %v795_v20 = vsub.s32 1, %v790_v61  ;;  %s881_s10 = sshll.u32 %s1667_s27, 4  ;;  %s1677_s10 = int_to_ptr.vmem [resolvable:$true] %s881_s10 }
  0x62   : > { %656 = vmatprep.subr.bf16.mxu0 %v1221_v14  ;;  %v1267_v58 = vld [vmem:[%s1611_s28 + $0xc4] ss:$12 sps:$4 sm:$0xff]   ;;  %s1352_s11 = scalar_lea.vmem %s1677_s10, 768  ;;  %p1748_p10 = scmp.ne.s32.totalorder %s1741_s25, 0 }
  0x63   : > { %v787_v63 = vld [vmem:[%s250_s20] sm:$0x7]  ;;  %p1353_p7 = scmp.ne.s32.totalorder %s1677_s10, %s1352_s11  ;;  %s1446_s15 = smov [#allocation9]  }
  0x64   : > { %1096 = vmatpush3.bf16.msra.mxu1 %v1248_v24  ;;  %v800_v1 = vrot.slane %v787_v63, %v799_v62  ;;  %v796_v24 = vrot.slane %v787_v63, %v795_v20  ;;  %s1356_s21 = sshll.u32 %s1446_s15, 4  ;;  %s1357_s21 = int_to_ptr.vmem [resolvable:$false] %s1356_s21 }
  0x65   : > { %657 = vmatpush1.bf16.msra.mxu0 %v1223_v17  ;;  %1097 = vmatprep.subr.bf16.mxu1 %v1251_v25  ;;  %p1354_p2 = pnand %p1353_p7, %p1748_p10  ;;  %s1358_s30 = scalar_lea.vmem %s1357_s21, 1536 }
  0x66   : > { %658 = vmatprep.subr.bf16.mxu0 %v1224_v19  ;;  %v791_v19 = vsub.s32 0, %v790_v61  ;;  %p1359_p0 = scmp.lt.s32.totalorder %s1677_s10, %s1357_s21  ;;  %p1360_p3 = scmp.lt.s32.totalorder %s1358_s30, %s1352_s11 }
  0x67   : > { %p1355_p1 = pneg %p1354_p2 }
  0x68   : > { %1098 = vmatpush3.bf16.msra.mxu1 %v1253_v28  ;;  %p1361_p4 = por %p1360_p3, %p1359_p0 }
  0x69   : > { %659 = vmatpush1.bf16.msra.mxu0 %v1227_v21  ;;  %1099 = vmatprep.subr.bf16.mxu1 %v1256_v29 }
  0x6a   : > { %660 = vmatprep.subr.bf16.mxu0 %v1229_v23  ;;  %v792_v23 = vrot.slane %v787_v63, %v791_v19  ;;  %p1362_p6 = pnand %p1361_p4, %p1355_p1 }
  0x6c   : > { %1100 = vmatpush3.bf16.msra.mxu1 %v1258_v33 }
  0x6d   : > { %661 = vmatpush1.bf16.msra.mxu0 %v1232_v26  ;;  %1101 = vmatprep.subr.bf16.mxu1 %v1261_v34 }
  0x6e   : > { %662 = vmatprep.subr.bf16.mxu0 %v1234_v27 }
  0x70   : > { %1102 = vmatpush3.bf16.msra.mxu1 %v1263_v38 }
  0x71   : > { %663 = vmatpush2.bf16.msra.mxu0 %v1237_v30 }
  0x72   : > { %664 = vmatprep.subr.bf16.mxu0 %v1239_v31 }
  0x73   : > { %732 = vmatmul.mubr.bf16.vlgmr.msra.gmra.mxu1 %v322_v46 }
  0x74   : > { %739 = vmatprep.mubr.bf16.mxu1 %v325_v47 }
  0x75   : > { %665 = vmatpush2.bf16.msra.mxu0 %v1242_v32 }
  0x76   : > { %666 = vmatprep.subr.bf16.mxu0 %v1244_v37 }
  0x79   : > { %667 = vmatpush2.bf16.msra.mxu0 %v1247_v43 }
  0x7a   : > { %668 = vmatprep.subr.bf16.mxu0 %v1249_v45 }
  0x7b   : > { %740 = vmatmul.mubr.bf16.gmra.mxu1 %v324_v54 }
  0x7d   : > { %669 = vmatpush2.bf16.msra.mxu0 %v1252_v48 }
  0x7e   : > { %670 = vmatprep.subr.bf16.mxu0 %v1254_v49 }
  0x81   : > { %671 = vmatpush2.bf16.msra.mxu0 %v1257_v52 }
  0x82   : > { %672 = vmatprep.subr.bf16.mxu0 %v1259_v53 }
  0x85   : > { %673 = vmatpush2.bf16.msra.mxu0 %v1262_v55 }
  0x86   : > { %674 = vmatprep.subr.bf16.mxu0 %v1264_v56 }
  0x89   : > { %675 = vmatpush2.bf16.msra.mxu0 %v1266_v57 }
  0x8a   : > { %676 = vmatprep.subr.bf16.mxu0 %v1267_v58 }
  0x8d   : > { %677 = vmatpush2.bf16.msra.mxu0 %v1269_v59 }
  0x90   : > { %679 = vmatmul.mubr.bf16.vlgmr.msra.gmra.mxu0 %v322_v46 }
  0x91   : > { %688 = vmatprep.mubr.bf16.mxu0 %v325_v47 }
  0x98   : > { %689 = vmatmul.mubr.bf16.gmra.mxu0 %v324_v54 }
 0x133   : > { %v1103_v0 = vpop.f32.mrf.mxu1 }
 0x135   : > { %v1104_v2 = vpop.f32.mrf.mxu1 }
 0x136   : > { %v1105_v3 = vadd.f32 %v1104_v2, %v1103_v0 }
 0x137   : > { %v1106_v4 = vpop.f32.mrf.mxu1 }
 0x138   : > { %v806_v5 = vadd.f32 %v1105_v3, %v800_v1 }
 0x139   : > { %v1107_v6 = vpop.f32.mrf.mxu1 }
 0x13a   : > { %v1079_v7 = vpack.c.bf16 %v806_v5, %v806_v5  ;;  %v1108_v8 = vadd.f32 %v1107_v6, %v1106_v4 }
 0x13b   : > { %v1109_v9 = vpop.f32.mrf.mxu1 }
 0x13c   : > { %857 = vst [vmem:[%s1667_s27 + $0x8] sm:$0xf] %v1079_v7  ;;  %v809_v10 = vadd.f32 %v1108_v8, %v800_v1 }
 0x13d   : > { %v1110_v11 = vpop.f32.mrf.mxu1 }
 0x13e   : > { %v1081_v12 = vpack.c.bf16 %v809_v10, %v809_v10  ;;  %v1111_v13 = vadd.f32 %v1110_v11, %v1109_v9 }
 0x13f   : > { %v1112_v14 = vpop.f32.mrf.mxu1 }
 0x140   : > { %859 = vst [vmem:[%s1667_s27 + $0x14] sm:$0xf] %v1081_v12  ;;  %v812_v15 = vadd.f32 %v1111_v13, %v800_v1 }
 0x141   : > { %v1113_v16 = vpop.f32.mrf.mxu1 }
 0x142   : > { %v1083_v17 = vpack.c.bf16 %v812_v15, %v812_v15  ;;  %v1114_v18 = vadd.f32 %v1113_v16, %v1112_v14 }
 0x144   : > { %861 = vst [vmem:[%s1667_s27 + $0x20] sm:$0xf] %v1083_v17  ;;  %v815_v21 = vadd.f32 %v1114_v18, %v800_v1 }
 0x146   : > { %v1085_v22 = vpack.c.bf16 %v815_v21, %v815_v21 }
 0x148   : > { %863 = vst [vmem:[%s1667_s27 + $0x2c] sm:$0xf] %v1085_v22 }
 0x150   : > { %v680_v25 = vpop.f32.mrf.mxu0 }
 0x151   : > { %v804_v27 = vadd.f32 %v792_v23, %v680_v25 }
 0x152   : > { %v682_v26 = vpop.f32.mrf.mxu0 }
 0x153   : > { %v805_v28 = vadd.f32 %v796_v24, %v682_v26 }
 0x154   : > { %v684_v29 = vpop.f32.mrf.mxu0 }
 0x155   : > { %v1078_v30 = vpack.c.bf16 %v805_v28, %v804_v27  ;;  %v807_v32 = vadd.f32 %v792_v23, %v684_v29 }
 0x156   : > { %v686_v31 = vpop.f32.mrf.mxu0 }
 0x157   : > { %856 = vst [vmem:[%s1667_s27] sm:$0xff] %v1078_v30  ;;  %v808_v33 = vadd.f32 %v796_v24, %v686_v31 }
 0x158   : > { %v690_v34 = vpop.f32.mrf.mxu0 }
 0x159   : > { %v1080_v35 = vpack.c.bf16 %v808_v33, %v807_v32  ;;  %v810_v37 = vadd.f32 %v792_v23, %v690_v34 }
 0x15a   : > { %v692_v36 = vpop.f32.mrf.mxu0 }
 0x15b   : > { %858 = vst [vmem:[%s1667_s27 + $0xc] sm:$0xff] %v1080_v35  ;;  %v811_v38 = vadd.f32 %v796_v24, %v692_v36 }
 0x15c   : > { %v694_v39 = vpop.f32.mrf.mxu0 }
 0x15d   : > { %v1082_v40 = vpack.c.bf16 %v811_v38, %v810_v37  ;;  %v813_v42 = vadd.f32 %v792_v23, %v694_v39 }
 0x15e   : > { %v696_v41 = vpop.f32.mrf.mxu0 }
 0x15f   : > { %860 = vst [vmem:[%s1667_s27 + $0x18] sm:$0xff] %v1082_v40  ;;  %v814_v43 = vadd.f32 %v796_v24, %v696_v41 }
 0x161   : > { %v1084_v44 = vpack.c.bf16 %v814_v43, %v813_v42 }
 0x163   : > { %862 = vst [vmem:[%s1667_s27 + $0x24] sm:$0xff] %v1084_v44 }
 0x164   : > { %1365 = shalt.err (!%p1362_p6)
}
 0x165   : > { %s1366_s29 = scalar_lea.hbm %s1683_s8, 768  ;;  %s1370_s5 = scalar_lea.hbm %s1735_s3, 1536 }
 0x166   : > { %p1367_p8 = scmp.ne.s32.totalorder %s1683_s8, %s1366_s29  ;;  %p1371_p11 = scmp.lt.s32.totalorder %s1683_s8, %s1735_s3 }
 0x167   : > { %p1372_p12 = scmp.lt.s32.totalorder %s1370_s5, %s1366_s29 }
 0x168   : > { %p1368_p5 = pnand %p1367_p8, %p1748_p10 }
 0x169   : > { %p1373_p13 = por %p1372_p12, %p1371_p11 }
 0x16a   : > { %p1369_p9 = pneg %p1368_p5 }
 0x16c   : > { %p1374_p7 = pnand %p1373_p13, %p1369_p9 }
 0x16e   : > { %1377 = shalt.err (!%p1374_p7)
}
 0x16f   : > { %s1447_s27 = smov 192   ;;  %s1448_s19 = smov 384  }
 0x170   : > { %s1449_s6 = smov 12  }
 0x171   : > { %1128 = dma.vmem_to_hbm [thread:$0]  (%p1748_p10), %s1677_s10, 768, %s1683_s8, %s865_s9, %s1447_s27, %s1448_s19, %s1449_s6  }
 0x172 PF: > { %s896_s4 = sand.u32 1, %s1416_s12   ;;  %p1749_p2 = scmp.ne.s32.totalorder %s1742_s26, 0 }
 0x173   : > { %p1750_p1 = scmp.ge.s32.totalorder %s1436_s17, 2  ;;  %s897_s11 = scalar_lea.sflag [#allocation5], %s896_s4 }
 0x175   : > { %p1142_p0 = pnand %p1750_p1, %p1749_p2 }
 0x177   : > { %p1143_p3 = pneg %p1142_p0 }
 0x179   : > { %1411 = dma.done.wait (%p1143_p3), %s897_s11, 768  }
 0x17a   : > { %1413 = vsyncadd (%p1143_p3), %s897_s11, 4294966528  ;;  %s20_s17 = sadd.s32 1, %s1436_s17   ;;  %s1751_s12 = smov %s1420_s13 }
 0x17b   : > { %p17_p4 = scmp.ge.s32.totalorder %s20_s17, 4   ;;  %s1752_s13 = smov %s1424_s14 }
 0x17c   : > { %s1753_s14 = smov %s1518_s24  ;;  %s1754_s15 = smov %s1432_s16 }
 0x17d   : > { %s1755_s16 = smov %s1757_s18  ;;  %19 = sbr.rel (!%p17_p4) target bundleno = 7 (0x7), region = 102 }
 0x182   :  { %902 = vsyncpa [#allocation4], 1 }
 0x183   :  { %904 = vsyncpa [#allocation4 + $0x1], 1 }
 0x184   :  { %905 = vsyncpa [#allocation7], 1 }
 0x185   :  { %907 = vsyncpa [#allocation7 + $0x1], 1 }
 0x186   :  { %908 = vsyncpa [#allocation5], 1 }
 0x187   :  { %910 = vsyncpa [#allocation5 + $0x1], 1 }

</bundles_post_ra>
